<compile_context>
chip_gen: v5e
topology: v5e:2x2
jax: 0.10.0
libtpu: 0.0.40
codegen_flags: <defaults>
</compile_context>

<pallas_src>
import functools

import jax
import jax.numpy as jnp
from jax.experimental import pallas as pl
from jax.experimental.pallas import tpu as pltpu


def _round_up(a: int, b: int) -> int:
    return (a + b - 1) // b * b


def _cdiv(a: int, b: int) -> int:
    return (a + b - 1) // b


def _choose_tiling(M, K_pad, N_pad, out_itemsize, tm=None,
                   vmem_budget_bytes=28 * 1024 * 1024):
    """Pick (tm, M_pad, vmem_limit_bytes) for the M-streamed GEMM.

    Per-grid-step VMEM:
      resident (constant index_map, 2 pipeline buffers): bf16 weight, f32 bias
      streamed (double buffered): bf16 patches tile, out tile
      plus the f32 accumulator tile that exists before the cast at the store.
    """
    resident = 2 * (K_pad * N_pad * 2) + 2 * (N_pad * 4)
    bytes_per_row = 2 * (K_pad * 2) + 2 * (N_pad * out_itemsize) + N_pad * 4
    cap = max(16, ((vmem_budget_bytes - resident) // bytes_per_row) // 16 * 16)

    if tm is None:
        tm = 1024                     # 512-1024: per-step work >> grid-step overhead
    tm = max(16, min((tm // 16) * 16, cap))   # multiple of 16 for bf16 sublane packing

    M16 = _round_up(max(M, 1), 16)
    tm = min(tm, M16)

    n_steps = _cdiv(M16, tm)
    # v7x megacore: both TensorCores only get work if the parallel M grid has
    # >= 2 steps; keep the step count even so the split is balanced.  Harmless
    # on single-TC v5e / v6e.
    if n_steps == 1 and M16 >= 32:
        n_steps = 2
    elif n_steps > 1 and n_steps % 2 == 1:
        n_steps += 1
    tm = max(16, _round_up(_cdiv(M16, n_steps), 16))
    M_pad = n_steps * tm

    vmem_use = resident + tm * bytes_per_row
    vmem_limit = int(vmem_use + max(vmem_use // 2, 4 * 1024 * 1024))
    return tm, M_pad, vmem_limit


def _patch_embed_kernel(x_ref, w_ref, b_ref, o_ref):
    # x_ref: (TM, K_pad) patches, w_ref: (K_pad, N_pad) weight (both compute
    # dtype, bf16 by default), b_ref: (1, N_pad) f32 bias, o_ref: (TM, N_pad).
    acc = jnp.dot(x_ref[...], w_ref[...], preferred_element_type=jnp.float32)
    acc = acc + b_ref[...]                     # f32 bias add, broadcast over rows
    o_ref[...] = acc.astype(o_ref.dtype)       # cast only at the store


def patch_embedding(x, weight, bias, patch_size, *, tm=None, out_dtype=None,
                    compute_dtype=jnp.bfloat16):
    """x: (B, C, H, W) NCHW; weight: (E, C, p, p) Conv2d weight; bias: (E,).

    Returns (B, num_patches, E), matching PatchEmbedding.forward.
    out_dtype defaults to x.dtype; pass jnp.bfloat16 to halve output HBM bytes.
    """
    B, C, H, W = x.shape
    E = weight.shape[0]
    p = patch_size
    nh, nw = H // p, W // p
    num_patches = nh * nw

    if out_dtype is None:
        out_dtype = x.dtype

    # im2col patch extraction (layout plumbing).  Inside jit, XLA fuses the
    # transpose + cast + pad into a single pass over x.
    # TODO(synk): fuse this into the Pallas kernel to drop the HBM round-trip.
    patches = x.reshape(B, C, nh, p, nw, p)
    patches = patches.transpose(0, 2, 4, 1, 3, 5)              # (B, nh, nw, C, p, p)
    patches = patches.reshape(B * num_patches, C * p * p)
    patches = patches.astype(compute_dtype)                    # (M, K)

    w_mat = weight.reshape(E, C * p * p).T.astype(compute_dtype)   # (K, N)

    M, K = B * num_patches, C * p * p
    N = E
    # Lane alignment: no-op for standard ViT sizes (K = C*p*p, E = 384/768/...).
    # For small/odd E the extra output lanes waste N_pad/N bandwidth - accepted.
    K_pad = _round_up(K, 128)
    N_pad = _round_up(N, 128)

    out_itemsize = jnp.dtype(out_dtype).itemsize
    tm, M_pad, vmem_limit = _choose_tiling(M, K_pad, N_pad, out_itemsize, tm=tm)

    patches_p = jnp.pad(patches, ((0, M_pad - M), (0, K_pad - K)))
    w_p = jnp.pad(w_mat, ((0, K_pad - K), (0, N_pad - N)))
    b_p = jnp.pad(bias.astype(jnp.float32)[None, :], ((0, 0), (0, N_pad - N)))

    cost = pl.CostEstimate(
        flops=2 * M_pad * K_pad * N_pad,
        transcendentals=0,
        bytes_accessed=(M_pad * K_pad * patches_p.dtype.itemsize
                        + K_pad * N_pad * w_p.dtype.itemsize
                        + N_pad * 4
                        + M_pad * N_pad * out_itemsize),
    )

    out = pl.pallas_call(
        _patch_embed_kernel,
        out_shape=jax.ShapeDtypeStruct((M_pad, N_pad), out_dtype),
        grid_spec=pltpu.PrefetchScalarGridSpec(
            num_scalar_prefetch=0,
            grid=(M_pad // tm,),
            in_specs=[
                # Streamed patch-row tiles.
                pl.BlockSpec((tm, K_pad), lambda i: (i, 0)),
                # Constant index_maps: weight and bias are DMA'd once and stay
                # VMEM-resident across the whole M grid.
                pl.BlockSpec((K_pad, N_pad), lambda i: (0, 0)),
                pl.BlockSpec((1, N_pad), lambda i: (0, 0)),
            ],
            out_specs=pl.BlockSpec((tm, N_pad), lambda i: (i, 0)),
        ),
        compiler_params=pltpu.CompilerParams(
            dimension_semantics=("parallel",),   # v7x: shard M steps across both TCs
            vmem_limit_bytes=vmem_limit,         # right-sized from actual buffers
        ),
        cost_estimate=cost,
    )(patches_p, w_p, b_p)

    return out[:M, :N].reshape(B, num_patches, E)


if __name__ == "__main__":
    # Small config consistent with the module: img_size=16, patch_size=4,
    # in_channels=4, embed_dim=32  ->  num_patches = (16//4)^2 = 16.
    B, C, H, W = 2, 4, 16, 16
    patch_size = 4
    embed_dim = 32

    key = jax.random.PRNGKey(0)
    kx, kw, kb = jax.random.split(key, 3)

    x = jax.random.normal(kx, (B, C, H, W), dtype=jnp.float32)
    weight = jax.random.normal(
        kw, (embed_dim, C, patch_size, patch_size), dtype=jnp.float32) * 0.02
    bias = jax.random.normal(kb, (embed_dim,), dtype=jnp.float32) * 0.02

    num_patches = (H // patch_size) * (W // patch_size)

    # Plain-JAX f32 conv reference (matches the PyTorch module's forward).
    ref = jax.lax.conv_general_dilated(
        x, weight, window_strides=(patch_size, patch_size), padding="VALID",
        dimension_numbers=("NCHW", "OIHW", "NCHW"))
    ref = ref + bias[None, :, None, None]
    ref = ref.reshape(B, embed_dim, -1).transpose(0, 2, 1)

    # Default path: output dtype follows x (f32 here); bf16 MXU inputs with
    # f32 accumulation -> slightly relaxed tolerance.
    fn = jax.jit(functools.partial(patch_embedding, patch_size=patch_size))
    out = jax.block_until_ready(fn(x, weight, bias))
    assert out.shape == (B, num_patches, embed_dim)
    assert out.dtype == x.dtype
    assert jnp.allclose(out, ref, atol=2e-2, rtol=2e-2)

    # bf16-output path (recommended for the mem-bound regime; downstream ViT
    # layers are typically bf16 anyway).
    fn_bf16 = jax.jit(functools.partial(patch_embedding, patch_size=patch_size,
                                        out_dtype=jnp.bfloat16))
    out_bf16 = jax.block_until_ready(fn_bf16(x, weight, bias))
    assert out_bf16.shape == (B, num_patches, embed_dim)
    assert out_bf16.dtype == jnp.bfloat16
    assert jnp.allclose(out_bf16.astype(jnp.float32), ref, atol=3e-2, rtol=3e-2)

    print("KERNEL_OK")
</pallas_src>

<mosaic_0001>
module attributes {stable_mosaic.version = 11 : i64} {
  func.func @_patch_embed_kernel(%arg0: i32, %arg1: memref<16x128xbf16, #tpu.memory_space<vmem>>, %arg2: memref<128x128xbf16, #tpu.memory_space<vmem>>, %arg3: memref<1x128xf32, #tpu.memory_space<vmem>>, %arg4: memref<16x128xf32, #tpu.memory_space<vmem>>) attributes {dimension_semantics = [#tpu.dimension_semantics<parallel>], iteration_bounds = array<i64: 2>, scalar_prefetch = 0 : i64, scratch_operands = 0 : i64, tpu.core_type = #tpu.core_type<tc>, window_params = [{transform_indices = @transform_0, window_bounds = array<i64: 16, 128>}, {pipeline_mode = #tpu.pipeline_mode<synchronous>, transform_indices = @transform_1, window_bounds = array<i64: 128, 128>}, {pipeline_mode = #tpu.pipeline_mode<synchronous>, transform_indices = @transform_2, window_bounds = array<i64: 1, 128>}, {transform_indices = @transform_3, window_bounds = array<i64: 16, 128>}]} {
    %c0 = arith.constant 0 : index
    %c0_0 = arith.constant 0 : index
    %0 = vector.load %arg1[%c0, %c0_0] : memref<16x128xbf16, #tpu.memory_space<vmem>>, vector<16x128xbf16>
    %c0_1 = arith.constant 0 : index
    %c0_2 = arith.constant 0 : index
    %1 = vector.load %arg2[%c0_1, %c0_2] : memref<128x128xbf16, #tpu.memory_space<vmem>>, vector<128x128xbf16>
    %cst = arith.constant dense<0.000000e+00> : vector<16x128xf32>
    %2 = tpu.matmul %0, %1, %cst {dimension_numbers = #tpu.dot_dimension_numbers<[1], [0], [0], [1], [0, 0, 1, 1], [], []>} : vector<16x128xbf16>, vector<128x128xbf16>, vector<16x128xf32> -> vector<16x128xf32>
    %c0_3 = arith.constant 0 : index
    %c0_4 = arith.constant 0 : index
    %3 = vector.load %arg3[%c0_3, %c0_4] : memref<1x128xf32, #tpu.memory_space<vmem>>, vector<1x128xf32>
    %4 = vector.broadcast %3 : vector<1x128xf32> to vector<16x128xf32>
    %5 = arith.addf %2, %4 : vector<16x128xf32>
    %c0_5 = arith.constant 0 : index
    %c0_6 = arith.constant 0 : index
    %6 = vector.load %arg4[%c0_5, %c0_6] : memref<16x128xf32, #tpu.memory_space<vmem>>, vector<16x128xf32>
    tpu.vector_store %arg4[%c0_5, %c0_6], %5 {strides = array<i32>} : memref<16x128xf32, #tpu.memory_space<vmem>>, vector<16x128xf32>,
    return
  }
  func.func @transform_0(%arg0: i32) -> (i32, i32) {
    %c0_i32 = arith.constant 0 : i32
    %c0_i32_0 = arith.constant 0 : i32
    return %arg0, %c0_i32 : i32, i32
  }
  func.func @transform_1(%arg0: i32) -> (i32, i32) {
    %c0_i32 = arith.constant 0 : i32
    %c0_i32_0 = arith.constant 0 : i32
    %c0_i32_1 = arith.constant 0 : i32
    return %c0_i32, %c0_i32_0 : i32, i32
  }
  func.func @transform_2(%arg0: i32) -> (i32, i32) {
    %c0_i32 = arith.constant 0 : i32
    %c0_i32_0 = arith.constant 0 : i32
    %c0_i32_1 = arith.constant 0 : i32
    return %c0_i32, %c0_i32_0 : i32, i32
  }
  func.func @transform_3(%arg0: i32) -> (i32, i32) {
    %c0_i32 = arith.constant 0 : i32
    %c0_i32_0 = arith.constant 0 : i32
    return %arg0, %c0_i32 : i32, i32
  }
}

</mosaic_0001>

<bundles_post_ra>
// kernel: patch_embedding.1
= control target key start
LH: loop header
LB: loop body
LE: loop exit
PB: predicated region body
PF: predicated region fallthrough
CT: control target
= control target key end

     0   :  { %8 = vsyncpa [#allocation3], 0  ;;  %s639_s0 = inlined_call_operand.vmem [shape: bf16[32,128], index: 0, kind: input, shape index: {}]   ;;  %s640_s1 = inlined_call_operand.vmem [shape: bf16[128,128], index: 1, kind: input, shape index: {}]   ;;  %s641_s2 = inlined_call_operand.vmem [shape: f32[1,128], index: 2, kind: input, shape index: {}]   ;;  %s642_s3 = inlined_call_operand.hbm [shape: f32[32,128], index: 3, kind: output, shape index: {}]  }
   0x1   :  { %10 = vsyncpa [#allocation3 + $0x1], 0  ;;  %s528_s12 = smov 0   ;;  %s530_s13 = smov 0  }
   0x2   :  { %s532_s14 = smov 0   ;;  %s534_s15 = smov 0  }
   0x3 LB: > { %s549_s16 = sadd.s32 4294967295, %s504_s15   ;;  %s342_s17 = sadd.s32 4294967294, %s504_s15   ;;  %s504_s15 = sphi %s534_s15, %s648_s15   ;;  %s500_s14 = sphi %s532_s14, %s647_s14   ;;  %s496_s13 = sphi %s530_s13, %s646_s13   ;;  %s492_s12 = sphi %s528_s12, %s645_s12  }
   0x4   : > { %s553_s18 = sadd.s32 1, %s504_s15   ;;  %s91_s19 = sadd.s32 1, %s500_s14 }
   0x5   : > { %s88_s20 = ssub.s32 %s504_s15, %s553_s18  ;;  %p101_p0 = scmp.ne.s32.totalorder %s500_s14, %s496_s13 }
   0x6   : > { %p89_p1 = scmp.eq.s32.totalorder %s88_s20, 0  ;;  %p102_p2 = scmp.eq.s32.totalorder %s549_s16, 1 }
   0x7   : > { %p107_p3 = scmp.ne.s32.totalorder %s496_s13, %s492_s12  ;;  %p108_p4 = scmp.eq.s32.totalorder %s342_s17, 1 }
   0x8   : > { %s564_s21 = scalar_select %p89_p1, %s500_s14, %s91_s19  }
   0x9   : > { %p566_p5 = por %p102_p2, %p101_p0  ;;  %p570_p6 = por %p108_p4, %p107_p3 }
   0xa   : > { %p345_p7 = scmp.ge.s32.totalorder %s504_s15, 1  ;;  %p141_p8 = scmp.lt.s32.totalorder %s504_s15, 3 }
   0xc   : > { %p142_p9 = pnand %p345_p7, %p141_p8 }
   0xd   : > { %s347_s5 = sshll.u32 (!%p142_p9), %s549_s16, 1  ;;  %s162_s27 = sand.u32 (!%p142_p9), 1, %s496_s13  }
   0xe   : > { %145 = sbr.rel (%p142_p9) target bundleno = 191 (0xbf), region = 32  ;;  %p166_p10 = scmp.lt.s32.totalorder (!%p142_p9), %s347_s5, 3 }
   0xf   : > { %s346_s28 = sshll.u32 (!%p142_p9), %s162_s27, 4  ;;  %s399_s4 = sshll.u32 (!%p142_p9), %s549_s16, 4 }
  0x10   : > { %s276_s7 = scalar_lea.hbm (!%p142_p9), %s642_s3, %s399_s4  ;;  %s164_s8 = scalar_lea.vmem (!%p142_p9), [#allocation2], %s346_s28 }
  0x11   : > { %s277_s9 = sshll.u32 (!%p142_p9), %s164_s8, 4  ;;  %s279_s10 = sshll.u32 (!%p142_p9), %s276_s7, 4  ;;  %s278_s9 = int_to_ptr.vmem [resolvable:$true] %s277_s9  ;;  %s280_s10 = int_to_ptr.hbm [resolvable:$true] %s279_s10 }
  0x12   : > { %s265_s11 = scalar_lea.sflag (!%p142_p9), [#allocation3], %s162_s27  ;;  %s462_s24 = scalar_lea.hbm (!%p142_p9), %s642_s3, 32 }
  0x13   : > { %v398_v0 = vld [vmem:[%s640_s1 + $0x38] sm:$0xff]  ;;  %v397_v1 = vld [vmem:[%s640_s1 + $0x30] sm:$0xff]  ;;  %v396_v2 = vld [vmem:[%s640_s1 + $0x28] sm:$0xff]  ;;  %s650_s5 = smov (!%p166_p10, %s347_s5), 3 }
  0x14   : > { %248 = vmatpush.bf16.msra.mxu0 %v398_v0  ;;  %v395_v3 = vld [vmem:[%s640_s1 + $0x20] sm:$0xff]  ;;  %v394_v4 = vld [vmem:[%s640_s1 + $0x18] sm:$0xff]  ;;  %v393_v5 = vld [vmem:[%s640_s1 + $0x10] sm:$0xff]  ;;  %s348_s17 = sshll.u32 %s650_s5, 2 }
  0x15   : > { %v392_v6 = vld [vmem:[%s640_s1 + $0x8] sm:$0xff]  ;;  %v391_v7 = vld [vmem:[%s640_s1] sm:$0xff]  ;;  %s169_s26 = scalar_lea.vmem %s639_s0, %s348_s17  ;;  %s456_s17 = sshra.s32 %s280_s10, 4  ;;  %s457_s17 = int_to_ptr.hbm [resolvable:$true] %s456_s17 }
  0x16   : > { %v390_v8 = vld [vmem:[%s169_s26] sm:$0xff]  ;;  %s458_s16 = scalar_lea.hbm %s457_s17, 16  ;;  %p463_p0 = scmp.lt.s32.totalorder %s457_s17, %s642_s3 }
  0x17   : > { %v441_v9 = vld [vmem:[%s641_s2] ss:$0 sm:$0xff]  ;;  %p459_p11 = scmp.ne.s32.totalorder %s457_s17, %s458_s16  ;;  %p464_p1 = scmp.lt.s32.totalorder %s462_s24, %s458_s16 }
  0x18   : > { %249 = vmatpush.bf16.msra.mxu0 %v397_v1 }
  0x19   : > { %p460_p12 = pnand %p459_p11, %p566_p5  ;;  %p465_p2 = por %p464_p1, %p463_p0 }
  0x1b   : > { %p461_p13 = pneg %p460_p12 }
  0x1c   : > { %250 = vmatpush.bf16.msra.mxu0 %v396_v2 }
  0x1d   : > { %p466_p3 = pnand %p465_p2, %p461_p13 }
  0x20   : > { %251 = vmatpush.bf16.msra.mxu0 %v395_v3 }
  0x24   : > { %252 = vmatpush.bf16.msra.mxu0 %v394_v4 }
  0x28   : > { %253 = vmatpush.bf16.msra.mxu0 %v393_v5 }
  0x2c   : > { %254 = vmatpush.bf16.msra.mxu0 %v392_v6 }
  0x30   : > { %255 = vmatpush.bf16.msra.mxu0 %v391_v7 }
  0x33   : > { %256 = vmatmul.bf16.vlgmr.msra.gmra.mxu0 %v390_v8 }
  0xb0   : > { %v257_v10 = vpop.f32.mrf.mxu0 }
  0xb1   : > { %v258_v11 = vadd.f32 %v441_v9, %v257_v10 }
  0xb3   : > { %262 = vst [vmem:[%s164_s8] sm:$0xff] %v258_v11 }
  0xb8   : > { %v259_v12 = vpop.f32.mrf.mxu0 }
  0xb9   : > { %v260_v13 = vadd.f32 %v441_v9, %v259_v12 }
  0xbb   : > { %263 = vst [vmem:[%s164_s8 + $0x8] sm:$0xff] %v260_v13 }
  0xbc   : > { %469 = shalt.err (!%p466_p3)
}
  0xbd   : > { %s506_s27 = smov 128   ;;  %s507_s28 = smov 8  }
  0xbe   : > { %400 = dma.vmem_to_hbm [thread:$0]  (%p566_p5), %s278_s9, 256, %s280_s10, %s265_s11, %s506_s27, %s506_s27, %s507_s28  }
  0xbf PF: > { %p406_p4 = scmp.ge.s32.totalorder %s504_s15, 2  ;;  %s294_s29 = sand.u32 1, %s492_s12  }
  0xc0   : > { %s295_s30 = scalar_lea.sflag [#allocation3], %s294_s29 }
  0xc1   : > { %p403_p7 = pnand %p406_p4, %p570_p6 }
  0xc3   : > { %p404_p8 = pneg %p403_p7 }
  0xc5   : > { %487 = dma.done.wait (%p404_p8), %s295_s30, 256  }
  0xc6   : > { %489 = vsyncadd (%p404_p8), %s295_s30, 4294967040  ;;  %p13_p9 = scmp.ge.s32.totalorder %s553_s18, 4   ;;  %s645_s12 = smov %s496_s13 }
  0xc7   : > { %s646_s13 = smov %s500_s14  ;;  %s647_s14 = smov %s564_s21 }
  0xc8   : > { %s648_s15 = smov %s553_s18  ;;  %15 = sbr.rel (!%p13_p9) target bundleno = 3 (0x3), region = 67 }
  0xcd   :  { %301 = vsyncpa [#allocation3], 1 }
  0xce   :  { %303 = vsyncpa [#allocation3 + $0x1], 1 }

</bundles_post_ra>
